<compile_context>
chip_gen: v7x
topology: tpu7x:2x2x1
jax: 0.10.0
libtpu: 0.0.40
codegen_flags: <defaults>
</compile_context>

<pallas_src>
import numpy as np
import jax
import jax.numpy as jnp
from jax.experimental import pallas as pl
from jax.experimental.pallas import tpu as pltpu


# ---------------- Pallas kernels ----------------
def _drop_path_kernel(scale_ref, x_ref, o_ref):
    # scale_ref: (TB, 1) per-sample factor (keep/keep_prob, 1/keep_prob folded in)
    # x_ref/o_ref: (TB, TF) feature slab; broadcast multiply over the lane axis.
    o_ref[...] = x_ref[...] * scale_ref[...]


def _drop_path_residual_kernel(scale_ref, x_ref, skip_ref, o_ref):
    # Fused: o = skip + branch * scale  (one extra vadd, 1/3 fewer HBM bytes
    # than a separate residual add at the XLA level).
    o_ref[...] = skip_ref[...] + x_ref[...] * scale_ref[...]


# ---------------- tiling helper ----------------
def _pick_tiles(b, feat, itemsize):
    # Batch tile: 8 sublane rows when possible, else the full batch dim
    # (block second-last dim must be a multiple of 8 or equal the array dim).
    tb = 8 if (b >= 8 and b % 8 == 0) else b
    if feat % 128 == 0:
        # Lane-dense tile, ~1 MiB per buffer so double-buffered in(+skip)+out
        # stays well under the default scoped-VMEM limit on all chips.
        tf_budget = max(128, (1 << 20) // (tb * itemsize))
        tf = min(feat, (tf_budget // 128) * 128)
    else:
        tf = feat  # ragged / toy feature count: use the full extent
    return tb, tf


# ---------------- wrapper (forward semantics of DropPath.forward) ----------------
def drop_path(x, drop_prob: float = 0.0, training: bool = False, *,
              key=None, residual=None):
    """DropPath forward. If `residual` is given, returns residual + drop_path(x)."""
    # Exact PyTorch early return: identity, no kernel launch at all.
    if drop_prob == 0.0 or not training:
        return x if residual is None else residual + x
    if key is None:
        raise ValueError("a jax PRNG key is required in training mode with drop_prob > 0")

    keep_prob = 1.0 - drop_prob
    b = x.shape[0]
    feat = int(np.prod(x.shape[1:]))

    # Per-sample decision computed ONCE (consistent across all feature tiles),
    # with the 1/keep_prob rescale folded in: scale = floor(keep_prob + U[0,1)) / keep_prob.
    u = jax.random.uniform(key, (b, 1), dtype=jnp.float32)
    scale = (jnp.floor(jnp.float32(keep_prob) + u) * jnp.float32(1.0 / keep_prob)
             ).astype(x.dtype)

    x2 = x.reshape(b, feat)                       # lane-dense (B, N*D) slab
    tb, tf = _pick_tiles(b, feat, x.dtype.itemsize)
    grid = (pl.cdiv(b, tb), pl.cdiv(feat, tf))

    scale_spec = pl.BlockSpec((tb, 1), lambda i, j: (i, 0))
    slab_spec = pl.BlockSpec((tb, tf), lambda i, j: (i, j))

    if residual is None:
        kernel = _drop_path_kernel
        inputs = (scale, x2)
        in_specs = [scale_spec, slab_spec]
    else:
        kernel = _drop_path_residual_kernel
        inputs = (scale, x2, residual.reshape(b, feat))
        in_specs = [scale_spec, slab_spec, slab_spec]

    out2 = pl.pallas_call(
        kernel,
        out_shape=jax.ShapeDtypeStruct((b, feat), x.dtype),
        grid=grid,
        in_specs=in_specs,
        out_specs=slab_spec,
        compiler_params=pltpu.CompilerParams(
            dimension_semantics=("parallel", "parallel")),
    )(*inputs)
    return out2.reshape(x.shape)


# ---------------- demo / self-check ----------------
if __name__ == "__main__":
    B, N_TOK, EMBED = 2, 16, 64          # (batch, tokens, dim) — feat = 1024 (lane-dense)
    DROP_PROB = 0.25

    root = jax.random.PRNGKey(0)
    kx, kr, km = jax.random.split(root, 3)
    x = jax.random.normal(kx, (B, N_TOK, EMBED), jnp.float32)
    skip = jax.random.normal(kr, (B, N_TOK, EMBED), jnp.float32)

    # 1) eval mode (and rate 0): exact identity, matching the PyTorch early return.
    y_eval = jax.block_until_ready(drop_path(x, DROP_PROB, training=False))
    np.testing.assert_array_equal(np.asarray(y_eval), np.asarray(x))

    # 2) training mode: run the Pallas kernel; deterministic for a fixed key.
    y = jax.block_until_ready(drop_path(x, DROP_PROB, training=True, key=km))
    y_again = jax.block_until_ready(drop_path(x, DROP_PROB, training=True, key=km))
    np.testing.assert_array_equal(np.asarray(y), np.asarray(y_again))

    # structural correctness: every sample is either fully dropped (zeros) or
    # exactly x / keep_prob (DropPath semantics).
    keep_prob = 1.0 - DROP_PROB
    xn, yn = np.asarray(x), np.asarray(y)
    for bi in range(B):
        kept = np.allclose(yn[bi], xn[bi] / keep_prob, rtol=1e-6, atol=1e-6)
        dropped = np.allclose(yn[bi], 0.0, atol=0.0)
        assert kept or dropped, f"sample {bi}: output is neither kept nor dropped"

    # 3) fused residual path: skip + drop_path(x) in a single kernel.
    y_fused = jax.block_until_ready(
        drop_path(x, DROP_PROB, training=True, key=km, residual=skip))
    np.testing.assert_allclose(np.asarray(y_fused), np.asarray(skip) + yn,
                               rtol=1e-6, atol=1e-6)

    print("KERNEL_OK")
</pallas_src>

<mosaic_0001>
module attributes {stable_mosaic.version = 11 : i64} {
  func.func @_drop_path_kernel(%arg0: i32, %arg1: i32, %arg2: memref<2x1xf32, #tpu.memory_space<vmem>>, %arg3: memref<2x1024xf32, #tpu.memory_space<vmem>>, %arg4: memref<2x1024xf32, #tpu.memory_space<vmem>>) attributes {dimension_semantics = [#tpu.dimension_semantics<parallel>, #tpu.dimension_semantics<parallel>], iteration_bounds = array<i64: 1, 1>, scalar_prefetch = 0 : i64, scratch_operands = 0 : i64, tpu.core_type = #tpu.core_type<tc>, window_params = [{transform_indices = @transform_0, window_bounds = array<i64: 2, 1>}, {transform_indices = @transform_1, window_bounds = array<i64: 2, 1024>}, {transform_indices = @transform_2, window_bounds = array<i64: 2, 1024>}]} {
    %c0 = arith.constant 0 : index
    %c0_0 = arith.constant 0 : index
    %0 = vector.load %arg3[%c0, %c0_0] : memref<2x1024xf32, #tpu.memory_space<vmem>>, vector<2x1024xf32>
    %c0_1 = arith.constant 0 : index
    %c0_2 = arith.constant 0 : index
    %1 = vector.load %arg2[%c0_1, %c0_2] : memref<2x1xf32, #tpu.memory_space<vmem>>, vector<2x1xf32>
    %2 = vector.broadcast %1 : vector<2x1xf32> to vector<2x1024xf32>
    %3 = arith.mulf %0, %2 : vector<2x1024xf32>
    %c0_3 = arith.constant 0 : index
    %c0_4 = arith.constant 0 : index
    %4 = vector.load %arg4[%c0_3, %c0_4] : memref<2x1024xf32, #tpu.memory_space<vmem>>, vector<2x1024xf32>
    tpu.vector_store %arg4[%c0_3, %c0_4], %3 {strides = array<i32>} : memref<2x1024xf32, #tpu.memory_space<vmem>>, vector<2x1024xf32>,
    return
  }
  func.func @transform_0(%arg0: i32, %arg1: i32) -> (i32, i32) {
    %c0_i32 = arith.constant 0 : i32
    %c0_i32_0 = arith.constant 0 : i32
    return %arg0, %c0_i32 : i32, i32
  }
  func.func @transform_1(%arg0: i32, %arg1: i32) -> (i32, i32) {
    %c0_i32 = arith.constant 0 : i32
    return %arg0, %arg1 : i32, i32
  }
  func.func @transform_2(%arg0: i32, %arg1: i32) -> (i32, i32) {
    %c0_i32 = arith.constant 0 : i32
    return %arg0, %arg1 : i32, i32
  }
}

</mosaic_0001>

<bundles_post_ra>
// kernel: tpu_custom_call.1
= control target key start
LH: loop header
LB: loop body
LE: loop exit
PB: predicated region body
PF: predicated region fallthrough
CT: control target
= control target key end

     0   :  { %7 = vsyncpa [#allocation3], 0  ;;  %s157_s0 = inlined_call_operand.vmem [shape: f32[2,1], index: 0, kind: input, shape index: {}]   ;;  %s158_s1 = inlined_call_operand.hbm [shape: f32[2,1024], index: 1, kind: input, shape index: {}]   ;;  %s159_s2 = inlined_call_operand.hbm [shape: f32[2,1024], index: 2, kind: output, shape index: {}]  }
   0x1   :  { %8 = vsyncpa [#allocation4], 0  ;;  %s111_s9 = smov [#allocation2]   ;;  %s63_s13 = scalar_lea.hbm %s158_s1, 256 }
   0x2   :  { %s17_s10 = sshll.u32 %s111_s9, 4  ;;  %p64_p0 = scmp.ne.s32.totalorder %s158_s1, %s63_s13  ;;  %s18_s10 = int_to_ptr.vmem [resolvable:$true] %s17_s10 }
   0x3   :  { %p67_p1 = scmp.lt.u32.totalorder %s63_s13, %s158_s1 }
   0x5   :  { %p69_p2 = pnand %p67_p1, %p64_p0 }
   0x7   :  { %72 = shalt.err (!%p69_p2)
}
   0x8   :  { %s73_s18 = scalar_lea.vmem %s18_s10, 256  ;;  %p78_p4 = scmp.lt.s32.totalorder %s18_s10, %s18_s10 }
   0x9   :  { %p74_p3 = scmp.ne.s32.totalorder %s18_s10, %s73_s18  ;;  %p79_p5 = scmp.lt.s32.totalorder %s73_s18, %s73_s18 }
   0xb   :  { %p80_p6 = por %p79_p5, %p78_p4 }
   0xd   :  { %p81_p7 = pnand %p80_p6, %p74_p3 }
   0xf   :  { %84 = shalt.err (!%p81_p7)
}
  0x10   :  { %20 = dma.hbm_to_vmem [thread:$0]  %s158_s1, 256, %s18_s10, [#allocation3]  }
  0x11   :  { %107 = dma.done.wait [#allocation3], 256  }
  0x12   :  { %108 = vsyncadd [#allocation3], 4294967040  ;;  %v112_v0 = vmov 0   ;;  %v26_v1 = vld [vmem:[%s157_s0] sm:$0x3]  ;;  %v34_v4 = vlaneseq  ;;  %v25_v10 = vld [vmem:[#allocation2 + $0x8] sm:$0xff] }
  0x13   :  { %62 = vset.pattern.permute.xlu0 %v112_v0  ;;  %v113_v2 = vmov 269488144   ;;  %v24_v9 = vld [vmem:[#allocation2] sm:$0xff]  ;;  %s114_s23 = smov [#allocation5]  }
  0x14   :  { %29 = vperm.xlu0 %62, %v26_v1   ;;  %v32_v3 = vunpack.c.l.s4 %v113_v2  ;;  %v35_v6 = vshrl.u32 %v34_v4, 7  ;;  %s49_s1 = sshll.u32 %s114_s23, 4  ;;  %s50_s1 = int_to_ptr.vmem [resolvable:$true] %s49_s1 }
  0x15   :  { %s85_s24 = scalar_lea.vmem %s50_s1, 256  ;;  %p90_p9 = scmp.lt.s32.totalorder %s50_s1, %s50_s1 }
  0x16   :  { %v33_v5 = vunpack.c.0.s8 %v32_v3  ;;  %p86_p8 = scmp.ne.s32.totalorder %s50_s1, %s85_s24  ;;  %p91_p10 = scmp.lt.s32.totalorder %s85_s24, %s85_s24 }
  0x18   :  { %v36_v7 = vsub.s32 %v33_v5, %v35_v6  ;;  %p92_p11 = por %p91_p10, %p90_p9 }
  0x1a   :  { %p93_p12 = pnand %p92_p11, %p86_p8 }
  0x93   :  { %v30_v8 = vpop.permute.xlu0 %29 }
  0x94   :  { %v37_v11 = vrot.slane %v30_v8, %v36_v7 }
  0x96   :  { %v39_v12 = vmul.f32 %v37_v11, %v24_v9  ;;  %v40_v13 = vmul.f32 %v37_v11, %v25_v10 }
  0x98   :  { %41 = vst [vmem:[#allocation5] sm:$0xff] %v39_v12  ;;  %42 = vst [vmem:[#allocation5 + $0x8] sm:$0xff] %v40_v13 }
  0x99   :  { %96 = shalt.err (!%p93_p12)
}
  0x9a   :  { %s97_s26 = scalar_lea.hbm %s159_s2, 256 }
  0x9b   :  { %p98_p13 = scmp.ne.s32.totalorder %s159_s2, %s97_s26  ;;  %p101_p0 = scmp.lt.u32.totalorder %s97_s26, %s159_s2 }
  0x9d   :  { %p103_p1 = pnand %p101_p0, %p98_p13 }
  0x9f   :  { %106 = shalt.err (!%p103_p1)
}
  0xa0   :  { %52 = dma.vmem_to_hbm [thread:$0]  %s50_s1, 256, %s159_s2, [#allocation4]  }
  0xa1   :  { %109 = dma.done.wait [#allocation4], 256  }
  0xa2   :  { %110 = vsyncadd [#allocation4], 4294967040 }
  0xa3   :  { %56 = vsyncpa [#allocation3], 1 }
  0xa4   :  { %57 = vsyncpa [#allocation4], 1 }

</bundles_post_ra>
